<compile_context>
chip_gen: v5e
topology: v5e:2x2
jax: 0.10.0
libtpu: 0.0.40
codegen_flags: <defaults>
</compile_context>

<pallas_src>
import functools

import jax
import jax.numpy as jnp
from jax.experimental import pallas as pl
from jax.experimental.pallas import tpu as pltpu


def _contrastive_loss_kernel(xt_ref, xb_ref, y_ref, out_ref, *, margin, batch, tile_m):
    # Inputs arrive in their native dtype; upcast in-register (f32 math).
    xt = xt_ref[...].astype(jnp.float32)                        # (TM, D)
    xb = xb_ref[...].astype(jnp.float32)                        # (TM, D)
    diff = xt - xb                                              # VPU
    dist_sq = jnp.sum(diff * diff, axis=1, keepdims=True)       # (TM, 1)  XLU reduce
    dist = jnp.sqrt(dist_sq)                                    # EUP
    mdist = jnp.maximum(margin - dist, 0.0)                     # clamp(min=0)
    y = y_ref[...].astype(jnp.float32)                          # (TM, 1)
    loss = y * dist_sq + (1.0 - y) * (mdist * mdist)            # (TM, 1)

    # Mask rows past the true batch size on the ragged final tile.  Use
    # jnp.where (select), so garbage padded rows (possibly inf/nan) can never
    # leak into the sum.
    row = jax.lax.broadcasted_iota(jnp.int32, loss.shape, 0) + pl.program_id(0) * tile_m
    loss = jnp.where(row < batch, loss, 0.0)

    partial = jnp.sum(loss)
    # Aligned (8, 128) output block -> one unmasked vector store per tile.
    # The wrapper reads [tile, 0, 0] and does the final reduce + scale.
    out_ref[...] = jnp.full(out_ref.shape, partial, dtype=out_ref.dtype)


def _pick_tile_and_vmem(B, D, itemsize):
    """Choose the batch-tile size TM and a scoped-VMEM limit for this chip."""
    try:
        vmem_cap = int(pltpu.get_tpu_info().vmem_capacity_bytes)
    except Exception:
        vmem_cap = 64 << 20  # conservative: v7x physical per-TC VMEM
    # Scoped window: half of physical, capped at 64 MiB.
    vmem_limit = min(vmem_cap // 2, 64 << 20)
    # 2 inputs x 2 pipeline buffers, plus ~2x headroom for labels/output/scratch.
    per_block_budget = vmem_limit // 8
    tm = per_block_budget // max(1, D * itemsize)
    tm = min(int(tm), 1024, B)  # ~1024 rows amortizes the ~0.35us/step overhead
    if tm >= B:
        tm = B  # single full-extent block (always a legal block shape)
    else:
        tm = max(8, (tm // 8) * 8)  # keep sublane (8) alignment when tiling
    # Make sure the limit actually covers the chosen working set.
    need = 4 * tm * D * itemsize + 4 * tm * 4 + 4 * 8 * 128 * 4 + (1 << 20)
    vmem_limit = min(vmem_cap, max(vmem_limit, need))
    return int(tm), int(vmem_limit)


def contrastive_loss(x_top, x_bottom, y, margin=1.0, tile_m=None):
    assert x_top.shape == x_bottom.shape and x_top.ndim == 2
    B, D = x_top.shape
    itemsize = jnp.dtype(x_top.dtype).itemsize

    auto_tm, vmem_limit = _pick_tile_and_vmem(B, D, itemsize)
    tm = int(tile_m) if tile_m is not None else auto_tm
    tm = min(tm, B)
    num_tiles = pl.cdiv(B, tm)

    # Labels as a lane-dim-1 2D array, native dtype (cast happens in-kernel).
    y2d = y.reshape(B, 1)

    kernel = functools.partial(
        _contrastive_loss_kernel, margin=float(margin), batch=int(B), tile_m=int(tm)
    )

    cost = pl.CostEstimate(
        flops=int(3 * B * D + 8 * B),
        transcendentals=int(B),
        bytes_accessed=int(
            2 * B * D * itemsize + B * jnp.dtype(y.dtype).itemsize + num_tiles * 8 * 128 * 4
        ),
    )

    partials = pl.pallas_call(
        kernel,
        out_shape=jax.ShapeDtypeStruct((num_tiles, 8, 128), jnp.float32),
        grid_spec=pltpu.PrefetchScalarGridSpec(
            num_scalar_prefetch=0,
            grid=(num_tiles,),
            in_specs=[
                pl.BlockSpec((tm, D), lambda i: (i, 0)),
                pl.BlockSpec((tm, D), lambda i: (i, 0)),
                pl.BlockSpec((tm, 1), lambda i: (i, 0)),
            ],
            out_specs=pl.BlockSpec((1, 8, 128), lambda i: (i, 0, 0)),
        ),
        compiler_params=pltpu.CompilerParams(
            dimension_semantics=("parallel",),  # independent partials -> megacore-safe
            vmem_limit_bytes=vmem_limit,
        ),
        cost_estimate=cost,
    )(x_top, x_bottom, y2d)

    # Tiny final reduction + folded (1/2)/B scale in the wrapper.
    return jnp.sum(partials[:, 0, 0]) * (0.5 / B)


def _reference(x_top, x_bottom, y, margin=1.0):
    x_top = x_top.astype(jnp.float32)
    x_bottom = x_bottom.astype(jnp.float32)
    y = y.astype(jnp.float32)
    diff = x_top - x_bottom
    dist_sq = jnp.sum(diff ** 2, axis=1)
    dist = jnp.sqrt(dist_sq)
    mdist = jnp.clip(margin - dist, 0.0, None)
    loss = y * dist_sq + (1 - y) * mdist ** 2
    return jnp.sum(loss) / 2.0 / x_top.shape[0]


if __name__ == "__main__":
    key = jax.random.PRNGKey(0)
    k1, k2, k3, k4, k5, k6 = jax.random.split(key, 6)

    # Case 1: small f32 batch, single full-extent tile.
    B, D = 8, 32
    x_top = jax.random.normal(k1, (B, D), dtype=jnp.float32)
    x_bottom = jax.random.normal(k2, (B, D), dtype=jnp.float32)
    y = jax.random.bernoulli(k3, 0.5, (B,)).astype(jnp.float32)

    loss = contrastive_loss(x_top, x_bottom, y, margin=1.0)
    jax.block_until_ready(loss)
    ref = _reference(x_top, x_bottom, y, margin=1.0)
    assert jnp.allclose(loss, ref, atol=1e-5, rtol=1e-5), (loss, ref)

    # Case 2: ragged tiling path (B=20 with forced TM=8 -> 3 tiles, masked tail)
    # and native bf16 inputs (upcast happens inside the kernel).
    B2, D2 = 20, 32
    xt2 = jax.random.normal(k4, (B2, D2), dtype=jnp.bfloat16)
    xb2 = jax.random.normal(k5, (B2, D2), dtype=jnp.bfloat16)
    y2 = jax.random.bernoulli(k6, 0.5, (B2,)).astype(jnp.float32)

    loss2 = contrastive_loss(xt2, xb2, y2, margin=1.0, tile_m=8)
    jax.block_until_ready(loss2)
    ref2 = _reference(xt2, xb2, y2, margin=1.0)
    assert jnp.allclose(loss2, ref2, atol=1e-4, rtol=1e-4), (loss2, ref2)

    print("KERNEL_OK")
</pallas_src>

<mosaic_0001>
module attributes {stable_mosaic.version = 11 : i64} {
  func.func @_contrastive_loss_kernel(%arg0: i32, %arg1: memref<8x32xf32, #tpu.memory_space<vmem>>, %arg2: memref<8x32xf32, #tpu.memory_space<vmem>>, %arg3: memref<8x1xf32, #tpu.memory_space<vmem>>, %arg4: memref<1x8x128xf32, #tpu.memory_space<vmem>>) attributes {dimension_semantics = [#tpu.dimension_semantics<parallel>], iteration_bounds = array<i64: 1>, scalar_prefetch = 0 : i64, scratch_operands = 0 : i64, tpu.core_type = #tpu.core_type<tc>, window_params = [{transform_indices = @transform_0, window_bounds = array<i64: 8, 32>}, {transform_indices = @transform_1, window_bounds = array<i64: 8, 32>}, {transform_indices = @transform_2, window_bounds = array<i64: 8, 1>}, {transform_indices = @transform_3, window_bounds = array<i64: 1, 8, 128>}]} {
    %c0 = arith.constant 0 : index
    %c0_0 = arith.constant 0 : index
    %0 = vector.load %arg1[%c0, %c0_0] : memref<8x32xf32, #tpu.memory_space<vmem>>, vector<8x32xf32>
    %c0_1 = arith.constant 0 : index
    %c0_2 = arith.constant 0 : index
    %1 = vector.load %arg2[%c0_1, %c0_2] : memref<8x32xf32, #tpu.memory_space<vmem>>, vector<8x32xf32>
    %2 = arith.subf %0, %1 : vector<8x32xf32>
    %3 = arith.mulf %2, %2 : vector<8x32xf32>
    %cst = arith.constant dense<0.000000e+00> : vector<8xf32>
    %4 = vector.multi_reduction <add>, %3, %cst [1] : vector<8x32xf32> to vector<8xf32>
    %5 = vector.shape_cast %4 : vector<8xf32> to vector<8x1xf32>
    %6 = math.sqrt %5 : vector<8x1xf32>
    %cst_3 = arith.constant 1.000000e+00 : f32
    %7 = vector.broadcast %cst_3 : f32 to vector<8x1xf32>
    %8 = arith.subf %7, %6 : vector<8x1xf32>
    %cst_4 = arith.constant 0.000000e+00 : f32
    %9 = vector.broadcast %cst_4 : f32 to vector<8x1xf32>
    %10 = arith.maximumf %8, %9 : vector<8x1xf32>
    %c0_5 = arith.constant 0 : index
    %c0_6 = arith.constant 0 : index
    %11 = vector.load %arg3[%c0_5, %c0_6] : memref<8x1xf32, #tpu.memory_space<vmem>>, vector<8x1xf32>
    %12 = arith.mulf %11, %5 : vector<8x1xf32>
    %cst_7 = arith.constant 1.000000e+00 : f32
    %13 = vector.broadcast %cst_7 : f32 to vector<8x1xf32>
    %14 = arith.subf %13, %11 : vector<8x1xf32>
    %15 = arith.mulf %10, %10 : vector<8x1xf32>
    %16 = arith.mulf %14, %15 : vector<8x1xf32>
    %17 = arith.addf %12, %16 : vector<8x1xf32>
    %18 = tpu.iota {dimensions = array<i32: 0>} : vector<8x1xi32>
    %c8_i32 = arith.constant 8 : i32
    %19 = arith.muli %arg0, %c8_i32 : i32
    %20 = vector.broadcast %19 : i32 to vector<8x1xi32>
    %21 = arith.addi %18, %20 : vector<8x1xi32>
    %c8_i32_8 = arith.constant 8 : i32
    %22 = vector.broadcast %c8_i32_8 : i32 to vector<8x1xi32>
    %23 = arith.cmpi slt, %21, %22 : vector<8x1xi32>
    %cst_9 = arith.constant 0.000000e+00 : f32
    %24 = vector.broadcast %cst_9 : f32 to vector<8x1xf32>
    %25 = arith.select %23, %17, %24 : vector<8x1xi1>, vector<8x1xf32>
    %26 = vector.shape_cast %25 : vector<8x1xf32> to vector<1x8x1xf32>
    %cst_10 = arith.constant dense<0.000000e+00> : vector<1xf32>
    %27 = vector.multi_reduction <add>, %26, %cst_10 [1, 2] : vector<1x8x1xf32> to vector<1xf32>
    %28 = vector.shape_cast %27 : vector<1xf32> to vector<1x1x1xf32>
    %29 = vector.extract %28[0, 0, 0] : f32 from vector<1x1x1xf32>
    %30 = vector.broadcast %29 : f32 to vector<1x8x128xf32>
    %c0_11 = arith.constant 0 : index
    %c0_12 = arith.constant 0 : index
    %c0_13 = arith.constant 0 : index
    %31 = vector.load %arg4[%c0_11, %c0_12, %c0_13] : memref<1x8x128xf32, #tpu.memory_space<vmem>>, vector<1x8x128xf32>
    tpu.vector_store %arg4[%c0_11, %c0_12, %c0_13], %30 {strides = array<i32>} : memref<1x8x128xf32, #tpu.memory_space<vmem>>, vector<1x8x128xf32>,
    return
  }
  func.func @transform_0(%arg0: i32) -> (i32, i32) {
    %c0_i32 = arith.constant 0 : i32
    %c0_i32_0 = arith.constant 0 : i32
    return %arg0, %c0_i32 : i32, i32
  }
  func.func @transform_1(%arg0: i32) -> (i32, i32) {
    %c0_i32 = arith.constant 0 : i32
    %c0_i32_0 = arith.constant 0 : i32
    return %arg0, %c0_i32 : i32, i32
  }
  func.func @transform_2(%arg0: i32) -> (i32, i32) {
    %c0_i32 = arith.constant 0 : i32
    %c0_i32_0 = arith.constant 0 : i32
    return %arg0, %c0_i32 : i32, i32
  }
  func.func @transform_3(%arg0: i32) -> (i32, i32, i32) {
    %c0_i32 = arith.constant 0 : i32
    %c0_i32_0 = arith.constant 0 : i32
    %c0_i32_1 = arith.constant 0 : i32
    return %arg0, %c0_i32, %c0_i32_0 : i32, i32, i32
  }
}

</mosaic_0001>

<bundles_post_ra>
// kernel: tpu_custom_call.1
= control target key start
LH: loop header
LB: loop body
LE: loop exit
PB: predicated region body
PF: predicated region fallthrough
CT: control target
= control target key end

     0   :  { %8 = vsyncpa [#allocation3], 0  ;;  %s186_s0 = inlined_call_operand.vmem [shape: f32[8,32], index: 0, kind: input, shape index: {}]   ;;  %s187_s1 = inlined_call_operand.hbm [shape: f32[8,32], index: 1, kind: input, shape index: {}]   ;;  %s188_s2 = inlined_call_operand.vmem [shape: f32[8,1], index: 2, kind: input, shape index: {}]   ;;  %s189_s3 = inlined_call_operand.hbm [shape: f32[1,8,128], index: 3, kind: output, shape index: {}]  }
   0x1   :  { %9 = vsyncpa [#allocation4], 0  ;;  %s17_s14 = sshll.u32 %s187_s1, 4  ;;  %s152_s15 = smov [#allocation2]   ;;  %s18_s14 = int_to_ptr.hbm [resolvable:$true] %s17_s14 }
   0x2   :  { %s19_s16 = sshll.u32 %s152_s15, 4  ;;  %s20_s16 = int_to_ptr.vmem [resolvable:$true] %s19_s16 }
   0x3   :  { %22 = dma.hbm_to_vmem [thread:$0]  %s18_s14, 128, %s20_s16, [#allocation3]  }
   0x4   :  { %148 = dma.done.wait [#allocation3], 128  }
   0x5   :  { %149 = vsyncadd [#allocation3], 4294967168  ;;  %v29_v0 = vld [vmem:[%s186_s0] sm:$0xff]  ;;  %vm33_vm0 = vcmask 261120   ;;  %vm64_vm3 = vcmask 7168   ;;  %s153_s19 = smov [#allocation5]  }
   0x6   :  { %v30_v1 = vld [vmem:[#allocation2] sm:$0xff]  ;;  %s82_s20 = sshll.u32 %s153_s19, 4  ;;  %s84_s22 = sshll.u32 %s189_s3, 4  ;;  %s83_s20 = int_to_ptr.vmem [resolvable:$true] %s82_s20  ;;  %s85_s22 = int_to_ptr.hbm [resolvable:$true] %s84_s22 }
   0x7   :  { %v31_v2 = vsub.f32 %v29_v0, %v30_v1  ;;  %v51_v17 = vld [vmem:[%s188_s2] sm:$0xff] }
   0x8   :  { %v53_v19 = vsub.f32 1.0, %v51_v17 }
   0x9   :  { %v32_v3 = vmul.f32 %v31_v2, %v31_v2 }
   0xb   :  { %v34_v4 = vsel %vm33_vm0, %v32_v3, 0.0 }
   0xc   :  { %35 = vadd.xlane.f32.xlu0 %v34_v4 }
  0x7f   :  { %v36_v5 = vpop.xlane.xlu0 %35 }
  0x80   :  { %98 = vrsqrt.f32 %v36_v5  ;;  %vm44_vm1 = vcmp.eq.f32.partialorder %v36_v5, inf  ;;  %v47_v13 = vand.u32 2147483648, %v36_v5  ;;  %vm46_vm2 = vcmp.eq.f32.partialorder %v36_v5, 0.0 }
  0x81   :  { %v52_v21 = vmul.f32 %v51_v17, %v36_v5 }
  0x86   :  { %v99_v6 = vpop.eup %98 }
  0x87   :  { %v38_v7 = vmul.f32 %v99_v6, %v36_v5 }
  0x89   :  { %v39_v8 = vmul.f32 %v99_v6, %v38_v7 }
  0x8b   :  { %v40_v9 = vmul.f32 0.5, %v39_v8 }
  0x8d   :  { %v41_v10 = vsub.f32 1.5, %v40_v9 }
  0x8f   :  { %v42_v11 = vmul.f32 %v99_v6, %v41_v10 }
  0x91   :  { %v43_v12 = vmul.f32 %v42_v11, %v36_v5 }
  0x93   :  { %v45_v14 = vsel %vm44_vm1, %v36_v5, %v43_v12 }
  0x94   :  { %v48_v15 = vsel %vm46_vm2, %v47_v13, %v45_v14 }
  0x95   :  { %v49_v16 = vsub.f32 1.0, %v48_v15 }
  0x97   :  { %v50_v18 = vmax.f32 %v49_v16, 0.0 }
  0x99   :  { %v54_v20 = vmul.f32 %v50_v18, %v50_v18 }
  0x9b   :  { %v55_v22 = vmul.f32 %v54_v20, %v53_v19 }
  0x9d   :  { %v56_v23 = vadd.f32 %v55_v22, %v52_v21 }
  0x9f   :  { %v65_v24 = vsel %vm64_vm3, %v56_v23, 0.0 }
  0xa0   :  { %66 = vadd.xlane.f32.xlu0 %v65_v24 }
 0x113   :  { %v67_v25 = vpop.xlane.xlu0 %66 }
 0x114   :  { %v68_v26 = vrot.slane %v67_v25, 4 }
 0x116   :  { %v69_v27 = vadd.f32 %v68_v26, %v67_v25 }
 0x118   :  { %v70_v28 = vrot.slane %v69_v27, 2 }
 0x11a   :  { %v71_v29 = vadd.f32 %v70_v28, %v69_v27 }
 0x11c   :  { %v72_v30 = vrot.slane %v71_v29, 1 }
 0x11e   :  { %v73_v31 = vadd.f32 %v72_v30, %v71_v29 }
 0x120   :  { %94 = vpush %v73_v31 }
 0x151   :  { %s95_s23 = spop %94 }
 0x152   :  { %v75_v32 = vstv %s95_s23 }
 0x153   :  { %76 = vst [vmem:[#allocation5] sm:$0xff] %v75_v32 }
 0x154   :  { %87 = dma.vmem_to_hbm [thread:$0]  %s83_s20, 128, %s85_s22, [#allocation4]  }
 0x155   :  { %150 = dma.done.wait [#allocation4], 128  }
 0x156   :  { %151 = vsyncadd [#allocation4], 4294967168 }
 0x157   :  { %92 = vsyncpa [#allocation3], 1 }
 0x158   :  { %93 = vsyncpa [#allocation4], 1 }

</bundles_post_ra>
